<compile_context>
chip_gen: v5e
topology: v5e:2x2
jax: 0.10.0
libtpu: 0.0.40
codegen_flags: <defaults>
</compile_context>

<pallas_src>
import functools

import jax
import jax.numpy as jnp
from jax.experimental import pallas as pl
from jax.experimental.pallas import tpu as pltpu


# ----------------------------------------------------------------------------
# Kernel bodies (per-block view: x_ref (Cin, S_TILE, 128), o_ref (Cout, S_TILE, 128))
# Weights/bias live in SMEM as scalars; compute is f32 regardless of I/O dtype,
# so bf16 frames also work (halving HBM traffic) with no kernel changes.
# ----------------------------------------------------------------------------
def _conv_kernel(w_ref, b_ref, x_ref, o_ref, *, relu):
    cin, cout = w_ref.shape
    for co in range(cout):
        acc = x_ref[0].astype(jnp.float32) * w_ref[0, co]
        for ci in range(1, cin):
            acc = acc + x_ref[ci].astype(jnp.float32) * w_ref[ci, co]
        acc = acc + b_ref[0, co]
        if relu:
            acc = jnp.maximum(acc, 0.0)
        o_ref[co] = acc.astype(o_ref.dtype)                 # direct per-channel store


def _conv_skip_kernel(w_ref, b_ref, x_ref, s_ref, o_ref, *, relu):
    # Skip/residual added AFTER the (optional) activation, as in the original.
    cin, cout = w_ref.shape
    for co in range(cout):
        acc = x_ref[0].astype(jnp.float32) * w_ref[0, co]
        for ci in range(1, cin):
            acc = acc + x_ref[ci].astype(jnp.float32) * w_ref[ci, co]
        acc = acc + b_ref[0, co]
        if relu:
            acc = jnp.maximum(acc, 0.0)
        acc = acc + s_ref[co].astype(jnp.float32)
        o_ref[co] = acc.astype(o_ref.dtype)


def _fused_mr_kernel(wm_ref, bm_ref, wr_ref, br_ref, x_ref, mo_ref, rc_ref):
    # Fused "conv_relu then conv_skip" pair:
    #   motion = relu(x @ Wm + bm);  recon = motion @ Wr + br + x
    # `motion` is written to its VMEM output block and read back from VMEM for
    # the second mix (cheap vld), never round-tripping through HBM.
    cin = x_ref.shape[0]
    cm = mo_ref.shape[0]
    cr = rc_ref.shape[0]
    for co in range(cm):
        acc = x_ref[0].astype(jnp.float32) * wm_ref[0, co]
        for ci in range(1, cin):
            acc = acc + x_ref[ci].astype(jnp.float32) * wm_ref[ci, co]
        acc = jnp.maximum(acc + bm_ref[0, co], 0.0)
        mo_ref[co] = acc.astype(mo_ref.dtype)
    for co in range(cr):
        acc = mo_ref[0].astype(jnp.float32) * wr_ref[0, co]
        for ci in range(1, cm):
            acc = acc + mo_ref[ci].astype(jnp.float32) * wr_ref[ci, co]
        acc = acc + br_ref[0, co] + x_ref[co].astype(jnp.float32)
        rc_ref[co] = acc.astype(rc_ref.dtype)


# ----------------------------------------------------------------------------
# Wrappers (layout folding + tiling + pallas_call plumbing)
# ----------------------------------------------------------------------------
_LANES = 128
# Sublane tile: 1024 x 128 lanes = 131072 px/channel -> 2 MiB f32 per 4-channel
# buffer; fused kernel (1 in + 2 out, double-buffered) ~12 MiB: fits every
# generation's VMEM (incl. v7x's 64 MiB) with the 32 MiB scoped limit below.
_MAX_S_TILE = 1024

_COMPILER_PARAMS = pltpu.CompilerParams(
    dimension_semantics=("parallel", "parallel"),
    vmem_limit_bytes=32 * 1024 * 1024,
)

_SMEM_SPEC = pl.BlockSpec(memory_space=pltpu.MemorySpace.SMEM)


def _choose_s_tile(n_sublanes, batch):
    """Sublane tile: a multiple of 8 (or the full extent), capped for VMEM."""
    max_tile = _MAX_S_TILE
    if batch == 1 and n_sublanes >= 16:
        # Keep >= 2 spatial blocks so both v7x TensorCores get work.
        half = -(-n_sublanes // 2)
        max_tile = min(max_tile, -(-half // 8) * 8)
    if n_sublanes <= max_tile:
        return n_sublanes          # single full-extent block (no /8 requirement)
    return max(8, (max_tile // 8) * 8)


def _fold(x_nchw, s_pad):
    """(B,C,H,W) -> (B,C,s_pad,128): contiguous reshape + one-time zero pad."""
    B, C, H, W = x_nchw.shape
    hw = H * W
    hw_pad = s_pad * _LANES
    x = x_nchw.reshape(B, C, hw)
    if hw_pad != hw:
        x = jnp.pad(x, ((0, 0), (0, 0), (0, hw_pad - hw)))
    return x.reshape(B, C, s_pad, _LANES)


def _unfold(y, B, C, H, W):
    hw = H * W
    return y.reshape(B, C, -1)[:, :, :hw].reshape(B, C, H, W)


def _tiling(H, W, batch):
    hw = H * W
    n_sub = pl.cdiv(hw, _LANES)               # 128-lane rows of spatial
    s_tile = _choose_s_tile(n_sub, batch)
    s_pad = -(-n_sub // s_tile) * s_tile      # ceil to a multiple of the tile
    return s_tile, s_pad


def _block_spec(channels, s_tile):
    return pl.BlockSpec((None, channels, s_tile, _LANES),
                        lambda bi, si: (bi, 0, si, 0))


def conv1x1(x_nchw, w, b, *, relu=False, skip_nchw=None):
    """Fused 1x1 conv (+bias, +optional ReLU, +optional skip) in NCHW.

    Channels + a spatial sub-tile sit on sublanes; 128 spatial px on lanes.
    No transposes anywhere; padding (if any) is sliced off on the way out.
    """
    B, Cin, H, W = x_nchw.shape
    Cout = w.shape[1]
    s_tile, s_pad = _tiling(H, W, B)
    grid = (B, s_pad // s_tile)

    x4 = _fold(x_nchw, s_pad)
    in_spec = _block_spec(Cin, s_tile)
    out_spec = _block_spec(Cout, s_tile)
    out_shape = jax.ShapeDtypeStruct((B, Cout, s_pad, _LANES), x_nchw.dtype)

    if skip_nchw is None:
        y = pl.pallas_call(
            functools.partial(_conv_kernel, relu=relu),
            out_shape=out_shape,
            grid=grid,
            in_specs=[_SMEM_SPEC, _SMEM_SPEC, in_spec],
            out_specs=out_spec,
            compiler_params=_COMPILER_PARAMS,
        )(w, b, x4)
    else:
        s4 = _fold(skip_nchw, s_pad)
        y = pl.pallas_call(
            functools.partial(_conv_skip_kernel, relu=relu),
            out_shape=out_shape,
            grid=grid,
            in_specs=[_SMEM_SPEC, _SMEM_SPEC, in_spec, _block_spec(Cout, s_tile)],
            out_specs=out_spec,
            compiler_params=_COMPILER_PARAMS,
        )(w, b, x4, s4)

    return _unfold(y, B, Cout, H, W)


def fused_conv_relu_conv_skip(x_nchw, wm, bm, wr, br):
    """motion = relu(conv1x1(x, Wm, bm)); recon = conv1x1(motion, Wr, br) + x."""
    B, Cin, H, W = x_nchw.shape
    Cm, Cr = wm.shape[1], wr.shape[1]
    s_tile, s_pad = _tiling(H, W, B)
    grid = (B, s_pad // s_tile)

    x4 = _fold(x_nchw, s_pad)
    mo, rc = pl.pallas_call(
        _fused_mr_kernel,
        out_shape=(jax.ShapeDtypeStruct((B, Cm, s_pad, _LANES), x_nchw.dtype),
                   jax.ShapeDtypeStruct((B, Cr, s_pad, _LANES), x_nchw.dtype)),
        grid=grid,
        in_specs=[_SMEM_SPEC, _SMEM_SPEC, _SMEM_SPEC, _SMEM_SPEC,
                  _block_spec(Cin, s_tile)],
        out_specs=(_block_spec(Cm, s_tile), _block_spec(Cr, s_tile)),
        compiler_params=_COMPILER_PARAMS,
    )(wm, bm, wr, br, x4)

    return _unfold(mo, B, Cm, H, W), _unfold(rc, B, Cr, H, W)


# ----------------------------------------------------------------------------
# Baseline: same dispatch semantics as the PyTorch module
# ----------------------------------------------------------------------------
class Baseline:
    """JAX/Pallas re-implementation of torchDVC Baseline.

    The module table is synthetic (stands in for
    get_model_config(csv_path)/get_module_args); parameters are deterministic.
    """

    def __init__(self, key, channels=4):
        # Synthetic stand-in for get_model_config(config_path):
        #   code -> {'name': attr name, 'type': MODELS key, ...}
        self.module_table = {
            "m": {"name": "Motion", "type": "conv_relu",
                  "in": "frame", "out": "motion"},
            "r": {"name": "Residual", "type": "conv_skip",
                  "in": "motion", "skip": "frame", "out": "recon"},
        }
        km_w, km_b, kr_w, kr_b = jax.random.split(key, 4)
        scale = 1.0 / jnp.sqrt(jnp.float32(channels))
        self.params = {
            "m": (scale * jax.random.normal(km_w, (channels, channels), jnp.float32),
                  0.1 * jax.random.normal(km_b, (1, channels), jnp.float32)),
            "r": (scale * jax.random.normal(kr_w, (channels, channels), jnp.float32),
                  0.1 * jax.random.normal(kr_b, (1, channels), jnp.float32)),
        }

    def aux_loss(self):
        # TODO(synk): EntropyBottleneck aux losses belong to external submodules
        # not defined in this file; nothing to aggregate here.
        return {}

    def _fuseable_pair(self, code, ncode):
        # TODO(synk): generalize to arbitrary chains whose intermediates are only
        # consumed by the next module; only the conv_relu->conv_skip pair for now.
        mprop = self.module_table[code.lower()]
        nprop = self.module_table[ncode.lower()]
        wm, _ = self.params[code.lower()]
        wr, _ = self.params[ncode.lower()]
        return (mprop["type"] == "conv_relu"
                and nprop["type"] == "conv_skip"
                and nprop["in"] == mprop["out"]
                and nprop.get("skip") == mprop["in"]
                and wm.shape[1] == wr.shape[0]
                and wr.shape[1] == wm.shape[0])

    def forward(self, phase, inputs, prop, header):
        data = {k: v for k, v in inputs.items()}
        codes = list(phase)
        i = 0
        while i < len(codes):
            code = codes[i]
            mprop = self.module_table[code.lower()]
            _ = {**header.get(code.lower(), {}), **mprop}  # merged header (as in torch)
            _train = code.isupper()  # torch toggles net.train(); inference-only here

            # Fused fast path: conv_relu immediately consumed by conv_skip.
            if i + 1 < len(codes) and self._fuseable_pair(code, codes[i + 1]):
                ncode = codes[i + 1]
                nprop = self.module_table[ncode.lower()]
                wm, bm = self.params[code.lower()]
                wr, br = self.params[ncode.lower()]
                mo, rc = fused_conv_relu_conv_skip(data[mprop["in"]], wm, bm, wr, br)
                data[mprop["out"]] = mo
                data[nprop["out"]] = rc
                i += 2
                continue

            w, b = self.params[code.lower()]
            if mprop["type"] == "conv_relu":
                data[mprop["out"]] = conv1x1(data[mprop["in"]], w, b, relu=True)
            elif mprop["type"] == "conv_skip":
                data[mprop["out"]] = conv1x1(
                    data[mprop["in"]], w, b, relu=False,
                    skip_nchw=data[mprop["skip"]])
            i += 1
        return data

    def load_RIFE_weight(self, path, rank=0):
        # TODO(synk): checkpoint loading (torch.load of flownet.pkl) has no Pallas
        # equivalent; parameters are deterministically initialized in __init__.
        pass

    def load_state_dict(self, path, rank=0):
        self.load_RIFE_weight(path, -1)


# ----------------------------------------------------------------------------
def _reference_forward(model, phase, inputs, header):
    """Pure-JAX reference to validate kernel output."""
    data = {k: v for k, v in inputs.items()}
    for code in phase:
        mprop = model.module_table[code.lower()]
        w, b = model.params[code.lower()]
        x = data[mprop["in"]]
        y = jnp.einsum("bchw,cd->bdhw", x, w) + b[0][None, :, None, None]
        if mprop["type"] == "conv_relu":
            y = jnp.maximum(y, 0.0)
        if mprop["type"] == "conv_skip":
            y = y + data[mprop["skip"]]
        data[mprop["out"]] = y
    return data


if __name__ == "__main__":
    key = jax.random.PRNGKey(0)
    k_model, k_x = jax.random.split(key)

    B, C, H, W = 2, 4, 16, 16
    x = jax.random.normal(k_x, (B, C, H, W), jnp.float32)

    model = Baseline(k_model, channels=C)
    inputs = {"frame": x}
    header = {"m": {"bpp": 0.0}, "r": {"bpp": 0.0}}

    # Primary phase: 'mr' exercises the fused two-layer kernel.
    out = model.forward("mr", inputs, prop=None, header=header)
    jax.block_until_ready(out["recon"])
    ref = _reference_forward(model, "mr", inputs, header)
    assert out["recon"].shape == (B, C, H, W)
    assert jnp.allclose(out["motion"], ref["motion"], atol=1e-5, rtol=1e-5)
    assert jnp.allclose(out["recon"], ref["recon"], atol=1e-5, rtol=1e-5)

    # Secondary phase: 'mmrr' also exercises the standalone conv_relu and
    # conv_skip kernels (first 'm' and last 'r' are not fuseable).
    out2 = model.forward("mmrr", inputs, prop=None, header=header)
    jax.block_until_ready(out2["recon"])
    ref2 = _reference_forward(model, "mmrr", inputs, header)
    assert jnp.allclose(out2["motion"], ref2["motion"], atol=1e-5, rtol=1e-5)
    assert jnp.allclose(out2["recon"], ref2["recon"], atol=1e-5, rtol=1e-5)

    print("KERNEL_OK")
</pallas_src>

<mosaic_0001>
module attributes {stable_mosaic.version = 11 : i64} {
  func.func @_fused_mr_kernel(%arg0: i32, %arg1: i32, %arg2: memref<4x4xf32, #tpu.memory_space<smem>>, %arg3: memref<1x4xf32, #tpu.memory_space<smem>>, %arg4: memref<4x4xf32, #tpu.memory_space<smem>>, %arg5: memref<1x4xf32, #tpu.memory_space<smem>>, %arg6: memref<1x4x2x128xf32, #tpu.memory_space<vmem>>, %arg7: memref<1x4x2x128xf32, #tpu.memory_space<vmem>>, %arg8: memref<1x4x2x128xf32, #tpu.memory_space<vmem>>) attributes {dimension_semantics = [#tpu.dimension_semantics<parallel>, #tpu.dimension_semantics<parallel>], iteration_bounds = array<i64: 2, 1>, scalar_prefetch = 0 : i64, scratch_operands = 0 : i64, tpu.core_type = #tpu.core_type<tc>, window_params = [{transform_indices = @transform_0, window_bounds = array<i64: 4, 4>}, {transform_indices = @transform_1, window_bounds = array<i64: 1, 4>}, {transform_indices = @transform_2, window_bounds = array<i64: 4, 4>}, {transform_indices = @transform_3, window_bounds = array<i64: 1, 4>}, {transform_indices = @transform_4, window_bounds = array<i64: 1, 4, 2, 128>}, {transform_indices = @transform_5, window_bounds = array<i64: 1, 4, 2, 128>}, {transform_indices = @transform_6, window_bounds = array<i64: 1, 4, 2, 128>}]} {
    %c0 = arith.constant 0 : index
    %c0_0 = arith.constant 0 : index
    %c0_1 = arith.constant 0 : index
    %c0_2 = arith.constant 0 : index
    %0 = vector.load %arg6[%c0, %c0_0, %c0_1, %c0_2] : memref<1x4x2x128xf32, #tpu.memory_space<vmem>>, vector<1x1x2x128xf32>
    %1 = vector.shape_cast %0 : vector<1x1x2x128xf32> to vector<2x128xf32>
    %c0_3 = arith.constant 0 : index
    %c0_4 = arith.constant 0 : index
    %2 = memref.load %arg2[%c0_3, %c0_4] : memref<4x4xf32, #tpu.memory_space<smem>>
    %3 = vector.broadcast %2 : f32 to vector<2x128xf32>
    %4 = arith.mulf %1, %3 : vector<2x128xf32>
    %c0_5 = arith.constant 0 : index
    %c1 = arith.constant 1 : index
    %c0_6 = arith.constant 0 : index
    %c0_7 = arith.constant 0 : index
    %5 = vector.load %arg6[%c0_5, %c1, %c0_6, %c0_7] : memref<1x4x2x128xf32, #tpu.memory_space<vmem>>, vector<1x1x2x128xf32>
    %6 = vector.shape_cast %5 : vector<1x1x2x128xf32> to vector<2x128xf32>
    %c1_8 = arith.constant 1 : index
    %c0_9 = arith.constant 0 : index
    %7 = memref.load %arg2[%c1_8, %c0_9] : memref<4x4xf32, #tpu.memory_space<smem>>
    %8 = vector.broadcast %7 : f32 to vector<2x128xf32>
    %9 = arith.mulf %6, %8 : vector<2x128xf32>
    %10 = arith.addf %4, %9 : vector<2x128xf32>
    %c0_10 = arith.constant 0 : index
    %c2 = arith.constant 2 : index
    %c0_11 = arith.constant 0 : index
    %c0_12 = arith.constant 0 : index
    %11 = vector.load %arg6[%c0_10, %c2, %c0_11, %c0_12] : memref<1x4x2x128xf32, #tpu.memory_space<vmem>>, vector<1x1x2x128xf32>
    %12 = vector.shape_cast %11 : vector<1x1x2x128xf32> to vector<2x128xf32>
    %c2_13 = arith.constant 2 : index
    %c0_14 = arith.constant 0 : index
    %13 = memref.load %arg2[%c2_13, %c0_14] : memref<4x4xf32, #tpu.memory_space<smem>>
    %14 = vector.broadcast %13 : f32 to vector<2x128xf32>
    %15 = arith.mulf %12, %14 : vector<2x128xf32>
    %16 = arith.addf %10, %15 : vector<2x128xf32>
    %c0_15 = arith.constant 0 : index
    %c3 = arith.constant 3 : index
    %c0_16 = arith.constant 0 : index
    %c0_17 = arith.constant 0 : index
    %17 = vector.load %arg6[%c0_15, %c3, %c0_16, %c0_17] : memref<1x4x2x128xf32, #tpu.memory_space<vmem>>, vector<1x1x2x128xf32>
    %18 = vector.shape_cast %17 : vector<1x1x2x128xf32> to vector<2x128xf32>
    %c3_18 = arith.constant 3 : index
    %c0_19 = arith.constant 0 : index
    %19 = memref.load %arg2[%c3_18, %c0_19] : memref<4x4xf32, #tpu.memory_space<smem>>
    %20 = vector.broadcast %19 : f32 to vector<2x128xf32>
    %21 = arith.mulf %18, %20 : vector<2x128xf32>
    %22 = arith.addf %16, %21 : vector<2x128xf32>
    %c0_20 = arith.constant 0 : index
    %c0_21 = arith.constant 0 : index
    %23 = memref.load %arg3[%c0_20, %c0_21] : memref<1x4xf32, #tpu.memory_space<smem>>
    %24 = vector.broadcast %23 : f32 to vector<2x128xf32>
    %25 = arith.addf %22, %24 : vector<2x128xf32>
    %cst = arith.constant 0.000000e+00 : f32
    %26 = vector.broadcast %cst : f32 to vector<2x128xf32>
    %27 = arith.maximumf %25, %26 : vector<2x128xf32>
    %c0_22 = arith.constant 0 : index
    %c0_23 = arith.constant 0 : index
    %c0_24 = arith.constant 0 : index
    %c0_25 = arith.constant 0 : index
    %28 = vector.load %arg7[%c0_22, %c0_23, %c0_24, %c0_25] : memref<1x4x2x128xf32, #tpu.memory_space<vmem>>, vector<1x1x2x128xf32>
    %29 = vector.shape_cast %28 : vector<1x1x2x128xf32> to vector<2x128xf32>
    %30 = vector.shape_cast %27 : vector<2x128xf32> to vector<1x1x2x128xf32>
    tpu.vector_store %arg7[%c0_22, %c0_23, %c0_24, %c0_25], %30 {strides = array<i32>} : memref<1x4x2x128xf32, #tpu.memory_space<vmem>>, vector<1x1x2x128xf32>,
    %c0_26 = arith.constant 0 : index
    %c0_27 = arith.constant 0 : index
    %c0_28 = arith.constant 0 : index
    %c0_29 = arith.constant 0 : index
    %31 = vector.load %arg6[%c0_26, %c0_27, %c0_28, %c0_29] : memref<1x4x2x128xf32, #tpu.memory_space<vmem>>, vector<1x1x2x128xf32>
    %32 = vector.shape_cast %31 : vector<1x1x2x128xf32> to vector<2x128xf32>
    %c0_30 = arith.constant 0 : index
    %c1_31 = arith.constant 1 : index
    %33 = memref.load %arg2[%c0_30, %c1_31] : memref<4x4xf32, #tpu.memory_space<smem>>
    %34 = vector.broadcast %33 : f32 to vector<2x128xf32>
    %35 = arith.mulf %32, %34 : vector<2x128xf32>
    %c0_32 = arith.constant 0 : index
    %c1_33 = arith.constant 1 : index
    %c0_34 = arith.constant 0 : index
    %c0_35 = arith.constant 0 : index
    %36 = vector.load %arg6[%c0_32, %c1_33, %c0_34, %c0_35] : memref<1x4x2x128xf32, #tpu.memory_space<vmem>>, vector<1x1x2x128xf32>
    %37 = vector.shape_cast %36 : vector<1x1x2x128xf32> to vector<2x128xf32>
    %c1_36 = arith.constant 1 : index
    %c1_37 = arith.constant 1 : index
    %38 = memref.load %arg2[%c1_36, %c1_37] : memref<4x4xf32, #tpu.memory_space<smem>>
    %39 = vector.broadcast %38 : f32 to vector<2x128xf32>
    %40 = arith.mulf %37, %39 : vector<2x128xf32>
    %41 = arith.addf %35, %40 : vector<2x128xf32>
    %c0_38 = arith.constant 0 : index
    %c2_39 = arith.constant 2 : index
    %c0_40 = arith.constant 0 : index
    %c0_41 = arith.constant 0 : index
    %42 = vector.load %arg6[%c0_38, %c2_39, %c0_40, %c0_41] : memref<1x4x2x128xf32, #tpu.memory_space<vmem>>, vector<1x1x2x128xf32>
    %43 = vector.shape_cast %42 : vector<1x1x2x128xf32> to vector<2x128xf32>
    %c2_42 = arith.constant 2 : index
    %c1_43 = arith.constant 1 : index
    %44 = memref.load %arg2[%c2_42, %c1_43] : memref<4x4xf32, #tpu.memory_space<smem>>
    %45 = vector.broadcast %44 : f32 to vector<2x128xf32>
    %46 = arith.mulf %43, %45 : vector<2x128xf32>
    %47 = arith.addf %41, %46 : vector<2x128xf32>
    %c0_44 = arith.constant 0 : index
    %c3_45 = arith.constant 3 : index
    %c0_46 = arith.constant 0 : index
    %c0_47 = arith.constant 0 : index
    %48 = vector.load %arg6[%c0_44, %c3_45, %c0_46, %c0_47] : memref<1x4x2x128xf32, #tpu.memory_space<vmem>>, vector<1x1x2x128xf32>
    %49 = vector.shape_cast %48 : vector<1x1x2x128xf32> to vector<2x128xf32>
    %c3_48 = arith.constant 3 : index
    %c1_49 = arith.constant 1 : index
    %50 = memref.load %arg2[%c3_48, %c1_49] : memref<4x4xf32, #tpu.memory_space<smem>>
    %51 = vector.broadcast %50 : f32 to vector<2x128xf32>
    %52 = arith.mulf %49, %51 : vector<2x128xf32>
    %53 = arith.addf %47, %52 : vector<2x128xf32>
    %c0_50 = arith.constant 0 : index
    %c1_51 = arith.constant 1 : index
    %54 = memref.load %arg3[%c0_50, %c1_51] : memref<1x4xf32, #tpu.memory_space<smem>>
    %55 = vector.broadcast %54 : f32 to vector<2x128xf32>
    %56 = arith.addf %53, %55 : vector<2x128xf32>
    %cst_52 = arith.constant 0.000000e+00 : f32
    %57 = vector.broadcast %cst_52 : f32 to vector<2x128xf32>
    %58 = arith.maximumf %56, %57 : vector<2x128xf32>
    %c0_53 = arith.constant 0 : index
    %c1_54 = arith.constant 1 : index
    %c0_55 = arith.constant 0 : index
    %c0_56 = arith.constant 0 : index
    %59 = vector.load %arg7[%c0_53, %c1_54, %c0_55, %c0_56] : memref<1x4x2x128xf32, #tpu.memory_space<vmem>>, vector<1x1x2x128xf32>
    %60 = vector.shape_cast %59 : vector<1x1x2x128xf32> to vector<2x128xf32>
    %61 = vector.shape_cast %58 : vector<2x128xf32> to vector<1x1x2x128xf32>
    tpu.vector_store %arg7[%c0_53, %c1_54, %c0_55, %c0_56], %61 {strides = array<i32>} : memref<1x4x2x128xf32, #tpu.memory_space<vmem>>, vector<1x1x2x128xf32>,
    %c0_57 = arith.constant 0 : index
    %c0_58 = arith.constant 0 : index
    %c0_59 = arith.constant 0 : index
    %c0_60 = arith.constant 0 : index
    %62 = vector.load %arg6[%c0_57, %c0_58, %c0_59, %c0_60] : memref<1x4x2x128xf32, #tpu.memory_space<vmem>>, vector<1x1x2x128xf32>
    %63 = vector.shape_cast %62 : vector<1x1x2x128xf32> to vector<2x128xf32>
    %c0_61 = arith.constant 0 : index
    %c2_62 = arith.constant 2 : index
    %64 = memref.load %arg2[%c0_61, %c2_62] : memref<4x4xf32, #tpu.memory_space<smem>>
    %65 = vector.broadcast %64 : f32 to vector<2x128xf32>
    %66 = arith.mulf %63, %65 : vector<2x128xf32>
    %c0_63 = arith.constant 0 : index
    %c1_64 = arith.constant 1 : index
    %c0_65 = arith.constant 0 : index
    %c0_66 = arith.constant 0 : index
    %67 = vector.load %arg6[%c0_63, %c1_64, %c0_65, %c0_66] : memref<1x4x2x128xf32, #tpu.memory_space<vmem>>, vector<1x1x2x128xf32>
    %68 = vector.shape_cast %67 : vector<1x1x2x128xf32> to vector<2x128xf32>
    %c1_67 = arith.constant 1 : index
    %c2_68 = arith.constant 2 : index
    %69 = memref.load %arg2[%c1_67, %c2_68] : memref<4x4xf32, #tpu.memory_space<smem>>
    %70 = vector.broadcast %69 : f32 to vector<2x128xf32>
    %71 = arith.mulf %68, %70 : vector<2x128xf32>
    %72 = arith.addf %66, %71 : vector<2x128xf32>
    %c0_69 = arith.constant 0 : index
    %c2_70 = arith.constant 2 : index
    %c0_71 = arith.constant 0 : index
    %c0_72 = arith.constant 0 : index
    %73 = vector.load %arg6[%c0_69, %c2_70, %c0_71, %c0_72] : memref<1x4x2x128xf32, #tpu.memory_space<vmem>>, vector<1x1x2x128xf32>
    %74 = vector.shape_cast %73 : vector<1x1x2x128xf32> to vector<2x128xf32>
    %c2_73 = arith.constant 2 : index
    %c2_74 = arith.constant 2 : index
    %75 = memref.load %arg2[%c2_73, %c2_74] : memref<4x4xf32, #tpu.memory_space<smem>>
    %76 = vector.broadcast %75 : f32 to vector<2x128xf32>
    %77 = arith.mulf %74, %76 : vector<2x128xf32>
    %78 = arith.addf %72, %77 : vector<2x128xf32>
    %c0_75 = arith.constant 0 : index
    %c3_76 = arith.constant 3 : index
    %c0_77 = arith.constant 0 : index
    %c0_78 = arith.constant 0 : index
    %79 = vector.load %arg6[%c0_75, %c3_76, %c0_77, %c0_78] : memref<1x4x2x128xf32, #tpu.memory_space<vmem>>, vector<1x1x2x128xf32>
    %80 = vector.shape_cast %79 : vector<1x1x2x128xf32> to vector<2x128xf32>
    %c3_79 = arith.constant 3 : index
    %c2_80 = arith.constant 2 : index
    %81 = memref.load %arg2[%c3_79, %c2_80] : memref<4x4xf32, #tpu.memory_space<smem>>
    %82 = vector.broadcast %81 : f32 to vector<2x128xf32>
    %83 = arith.mulf %80, %82 : vector<2x128xf32>
    %84 = arith.addf %78, %83 : vector<2x128xf32>
    %c0_81 = arith.constant 0 : index
    %c2_82 = arith.constant 2 : index
    %85 = memref.load %arg3[%c0_81, %c2_82] : memref<1x4xf32, #tpu.memory_space<smem>>
    %86 = vector.broadcast %85 : f32 to vector<2x128xf32>
    %87 = arith.addf %84, %86 : vector<2x128xf32>
    %cst_83 = arith.constant 0.000000e+00 : f32
    %88 = vector.broadcast %cst_83 : f32 to vector<2x128xf32>
    %89 = arith.maximumf %87, %88 : vector<2x128xf32>
    %c0_84 = arith.constant 0 : index
    %c2_85 = arith.constant 2 : index
    %c0_86 = arith.constant 0 : index
    %c0_87 = arith.constant 0 : index
    %90 = vector.load %arg7[%c0_84, %c2_85, %c0_86, %c0_87] : memref<1x4x2x128xf32, #tpu.memory_space<vmem>>, vector<1x1x2x128xf32>
    %91 = vector.shape_cast %90 : vector<1x1x2x128xf32> to vector<2x128xf32>
    %92 = vector.shape_cast %89 : vector<2x128xf32> to vector<1x1x2x128xf32>
    tpu.vector_store %arg7[%c0_84, %c2_85, %c0_86, %c0_87], %92 {strides = array<i32>} : memref<1x4x2x128xf32, #tpu.memory_space<vmem>>, vector<1x1x2x128xf32>,
    %c0_88 = arith.constant 0 : index
    %c0_89 = arith.constant 0 : index
    %c0_90 = arith.constant 0 : index
    %c0_91 = arith.constant 0 : index
    %93 = vector.load %arg6[%c0_88, %c0_89, %c0_90, %c0_91] : memref<1x4x2x128xf32, #tpu.memory_space<vmem>>, vector<1x1x2x128xf32>
    %94 = vector.shape_cast %93 : vector<1x1x2x128xf32> to vector<2x128xf32>
    %c0_92 = arith.constant 0 : index
    %c3_93 = arith.constant 3 : index
    %95 = memref.load %arg2[%c0_92, %c3_93] : memref<4x4xf32, #tpu.memory_space<smem>>
    %96 = vector.broadcast %95 : f32 to vector<2x128xf32>
    %97 = arith.mulf %94, %96 : vector<2x128xf32>
    %c0_94 = arith.constant 0 : index
    %c1_95 = arith.constant 1 : index
    %c0_96 = arith.constant 0 : index
    %c0_97 = arith.constant 0 : index
    %98 = vector.load %arg6[%c0_94, %c1_95, %c0_96, %c0_97] : memref<1x4x2x128xf32, #tpu.memory_space<vmem>>, vector<1x1x2x128xf32>
    %99 = vector.shape_cast %98 : vector<1x1x2x128xf32> to vector<2x128xf32>
    %c1_98 = arith.constant 1 : index
    %c3_99 = arith.constant 3 : index
    %100 = memref.load %arg2[%c1_98, %c3_99] : memref<4x4xf32, #tpu.memory_space<smem>>
    %101 = vector.broadcast %100 : f32 to vector<2x128xf32>
    %102 = arith.mulf %99, %101 : vector<2x128xf32>
    %103 = arith.addf %97, %102 : vector<2x128xf32>
    %c0_100 = arith.constant 0 : index
    %c2_101 = arith.constant 2 : index
    %c0_102 = arith.constant 0 : index
    %c0_103 = arith.constant 0 : index
    %104 = vector.load %arg6[%c0_100, %c2_101, %c0_102, %c0_103] : memref<1x4x2x128xf32, #tpu.memory_space<vmem>>, vector<1x1x2x128xf32>
    %105 = vector.shape_cast %104 : vector<1x1x2x128xf32> to vector<2x128xf32>
    %c2_104 = arith.constant 2 : index
    %c3_105 = arith.constant 3 : index
    %106 = memref.load %arg2[%c2_104, %c3_105] : memref<4x4xf32, #tpu.memory_space<smem>>
    %107 = vector.broadcast %106 : f32 to vector<2x128xf32>
    %108 = arith.mulf %105, %107 : vector<2x128xf32>
    %109 = arith.addf %103, %108 : vector<2x128xf32>
    %c0_106 = arith.constant 0 : index
    %c3_107 = arith.constant 3 : index
    %c0_108 = arith.constant 0 : index
    %c0_109 = arith.constant 0 : index
    %110 = vector.load %arg6[%c0_106, %c3_107, %c0_108, %c0_109] : memref<1x4x2x128xf32, #tpu.memory_space<vmem>>, vector<1x1x2x128xf32>
    %111 = vector.shape_cast %110 : vector<1x1x2x128xf32> to vector<2x128xf32>
    %c3_110 = arith.constant 3 : index
    %c3_111 = arith.constant 3 : index
    %112 = memref.load %arg2[%c3_110, %c3_111] : memref<4x4xf32, #tpu.memory_space<smem>>
    %113 = vector.broadcast %112 : f32 to vector<2x128xf32>
    %114 = arith.mulf %111, %113 : vector<2x128xf32>
    %115 = arith.addf %109, %114 : vector<2x128xf32>
    %c0_112 = arith.constant 0 : index
    %c3_113 = arith.constant 3 : index
    %116 = memref.load %arg3[%c0_112, %c3_113] : memref<1x4xf32, #tpu.memory_space<smem>>
    %117 = vector.broadcast %116 : f32 to vector<2x128xf32>
    %118 = arith.addf %115, %117 : vector<2x128xf32>
    %cst_114 = arith.constant 0.000000e+00 : f32
    %119 = vector.broadcast %cst_114 : f32 to vector<2x128xf32>
    %120 = arith.maximumf %118, %119 : vector<2x128xf32>
    %c0_115 = arith.constant 0 : index
    %c3_116 = arith.constant 3 : index
    %c0_117 = arith.constant 0 : index
    %c0_118 = arith.constant 0 : index
    %121 = vector.load %arg7[%c0_115, %c3_116, %c0_117, %c0_118] : memref<1x4x2x128xf32, #tpu.memory_space<vmem>>, vector<1x1x2x128xf32>
    %122 = vector.shape_cast %121 : vector<1x1x2x128xf32> to vector<2x128xf32>
    %123 = vector.shape_cast %120 : vector<2x128xf32> to vector<1x1x2x128xf32>
    tpu.vector_store %arg7[%c0_115, %c3_116, %c0_117, %c0_118], %123 {strides = array<i32>} : memref<1x4x2x128xf32, #tpu.memory_space<vmem>>, vector<1x1x2x128xf32>,
    %c0_119 = arith.constant 0 : index
    %c0_120 = arith.constant 0 : index
    %c0_121 = arith.constant 0 : index
    %c0_122 = arith.constant 0 : index
    %124 = vector.load %arg7[%c0_119, %c0_120, %c0_121, %c0_122] : memref<1x4x2x128xf32, #tpu.memory_space<vmem>>, vector<1x1x2x128xf32>
    %125 = vector.shape_cast %124 : vector<1x1x2x128xf32> to vector<2x128xf32>
    %c0_123 = arith.constant 0 : index
    %c0_124 = arith.constant 0 : index
    %126 = memref.load %arg4[%c0_123, %c0_124] : memref<4x4xf32, #tpu.memory_space<smem>>
    %127 = vector.broadcast %126 : f32 to vector<2x128xf32>
    %128 = arith.mulf %125, %127 : vector<2x128xf32>
    %c0_125 = arith.constant 0 : index
    %c1_126 = arith.constant 1 : index
    %c0_127 = arith.constant 0 : index
    %c0_128 = arith.constant 0 : index
    %129 = vector.load %arg7[%c0_125, %c1_126, %c0_127, %c0_128] : memref<1x4x2x128xf32, #tpu.memory_space<vmem>>, vector<1x1x2x128xf32>
    %130 = vector.shape_cast %129 : vector<1x1x2x128xf32> to vector<2x128xf32>
    %c1_129 = arith.constant 1 : index
    %c0_130 = arith.constant 0 : index
    %131 = memref.load %arg4[%c1_129, %c0_130] : memref<4x4xf32, #tpu.memory_space<smem>>
    %132 = vector.broadcast %131 : f32 to vector<2x128xf32>
    %133 = arith.mulf %130, %132 : vector<2x128xf32>
    %134 = arith.addf %128, %133 : vector<2x128xf32>
    %c0_131 = arith.constant 0 : index
    %c2_132 = arith.constant 2 : index
    %c0_133 = arith.constant 0 : index
    %c0_134 = arith.constant 0 : index
    %135 = vector.load %arg7[%c0_131, %c2_132, %c0_133, %c0_134] : memref<1x4x2x128xf32, #tpu.memory_space<vmem>>, vector<1x1x2x128xf32>
    %136 = vector.shape_cast %135 : vector<1x1x2x128xf32> to vector<2x128xf32>
    %c2_135 = arith.constant 2 : index
    %c0_136 = arith.constant 0 : index
    %137 = memref.load %arg4[%c2_135, %c0_136] : memref<4x4xf32, #tpu.memory_space<smem>>
    %138 = vector.broadcast %137 : f32 to vector<2x128xf32>
    %139 = arith.mulf %136, %138 : vector<2x128xf32>
    %140 = arith.addf %134, %139 : vector<2x128xf32>
    %c0_137 = arith.constant 0 : index
    %c3_138 = arith.constant 3 : index
    %c0_139 = arith.constant 0 : index
    %c0_140 = arith.constant 0 : index
    %141 = vector.load %arg7[%c0_137, %c3_138, %c0_139, %c0_140] : memref<1x4x2x128xf32, #tpu.memory_space<vmem>>, vector<1x1x2x128xf32>
    %142 = vector.shape_cast %141 : vector<1x1x2x128xf32> to vector<2x128xf32>
    %c3_141 = arith.constant 3 : index
    %c0_142 = arith.constant 0 : index
    %143 = memref.load %arg4[%c3_141, %c0_142] : memref<4x4xf32, #tpu.memory_space<smem>>
    %144 = vector.broadcast %143 : f32 to vector<2x128xf32>
    %145 = arith.mulf %142, %144 : vector<2x128xf32>
    %146 = arith.addf %140, %145 : vector<2x128xf32>
    %c0_143 = arith.constant 0 : index
    %c0_144 = arith.constant 0 : index
    %147 = memref.load %arg5[%c0_143, %c0_144] : memref<1x4xf32, #tpu.memory_space<smem>>
    %148 = vector.broadcast %147 : f32 to vector<2x128xf32>
    %149 = arith.addf %146, %148 : vector<2x128xf32>
    %c0_145 = arith.constant 0 : index
    %c0_146 = arith.constant 0 : index
    %c0_147 = arith.constant 0 : index
    %c0_148 = arith.constant 0 : index
    %150 = vector.load %arg6[%c0_145, %c0_146, %c0_147, %c0_148] : memref<1x4x2x128xf32, #tpu.memory_space<vmem>>, vector<1x1x2x128xf32>
    %151 = vector.shape_cast %150 : vector<1x1x2x128xf32> to vector<2x128xf32>
    %152 = arith.addf %149, %151 : vector<2x128xf32>
    %c0_149 = arith.constant 0 : index
    %c0_150 = arith.constant 0 : index
    %c0_151 = arith.constant 0 : index
    %c0_152 = arith.constant 0 : index
    %153 = vector.load %arg8[%c0_149, %c0_150, %c0_151, %c0_152] : memref<1x4x2x128xf32, #tpu.memory_space<vmem>>, vector<1x1x2x128xf32>
    %154 = vector.shape_cast %153 : vector<1x1x2x128xf32> to vector<2x128xf32>
    %155 = vector.shape_cast %152 : vector<2x128xf32> to vector<1x1x2x128xf32>
    tpu.vector_store %arg8[%c0_149, %c0_150, %c0_151, %c0_152], %155 {strides = array<i32>} : memref<1x4x2x128xf32, #tpu.memory_space<vmem>>, vector<1x1x2x128xf32>,
    %c0_153 = arith.constant 0 : index
    %c0_154 = arith.constant 0 : index
    %c0_155 = arith.constant 0 : index
    %c0_156 = arith.constant 0 : index
    %156 = vector.load %arg7[%c0_153, %c0_154, %c0_155, %c0_156] : memref<1x4x2x128xf32, #tpu.memory_space<vmem>>, vector<1x1x2x128xf32>
    %157 = vector.shape_cast %156 : vector<1x1x2x128xf32> to vector<2x128xf32>
    %c0_157 = arith.constant 0 : index
    %c1_158 = arith.constant 1 : index
    %158 = memref.load %arg4[%c0_157, %c1_158] : memref<4x4xf32, #tpu.memory_space<smem>>
    %159 = vector.broadcast %158 : f32 to vector<2x128xf32>
    %160 = arith.mulf %157, %159 : vector<2x128xf32>
    %c0_159 = arith.constant 0 : index
    %c1_160 = arith.constant 1 : index
    %c0_161 = arith.constant 0 : index
    %c0_162 = arith.constant 0 : index
    %161 = vector.load %arg7[%c0_159, %c1_160, %c0_161, %c0_162] : memref<1x4x2x128xf32, #tpu.memory_space<vmem>>, vector<1x1x2x128xf32>
    %162 = vector.shape_cast %161 : vector<1x1x2x128xf32> to vector<2x128xf32>
    %c1_163 = arith.constant 1 : index
    %c1_164 = arith.constant 1 : index
    %163 = memref.load %arg4[%c1_163, %c1_164] : memref<4x4xf32, #tpu.memory_space<smem>>
    %164 = vector.broadcast %163 : f32 to vector<2x128xf32>
    %165 = arith.mulf %162, %164 : vector<2x128xf32>
    %166 = arith.addf %160, %165 : vector<2x128xf32>
    %c0_165 = arith.constant 0 : index
    %c2_166 = arith.constant 2 : index
    %c0_167 = arith.constant 0 : index
    %c0_168 = arith.constant 0 : index
    %167 = vector.load %arg7[%c0_165, %c2_166, %c0_167, %c0_168] : memref<1x4x2x128xf32, #tpu.memory_space<vmem>>, vector<1x1x2x128xf32>
    %168 = vector.shape_cast %167 : vector<1x1x2x128xf32> to vector<2x128xf32>
    %c2_169 = arith.constant 2 : index
    %c1_170 = arith.constant 1 : index
    %169 = memref.load %arg4[%c2_169, %c1_170] : memref<4x4xf32, #tpu.memory_space<smem>>
    %170 = vector.broadcast %169 : f32 to vector<2x128xf32>
    %171 = arith.mulf %168, %170 : vector<2x128xf32>
    %172 = arith.addf %166, %171 : vector<2x128xf32>
    %c0_171 = arith.constant 0 : index
    %c3_172 = arith.constant 3 : index
    %c0_173 = arith.constant 0 : index
    %c0_174 = arith.constant 0 : index
    %173 = vector.load %arg7[%c0_171, %c3_172, %c0_173, %c0_174] : memref<1x4x2x128xf32, #tpu.memory_space<vmem>>, vector<1x1x2x128xf32>
    %174 = vector.shape_cast %173 : vector<1x1x2x128xf32> to vector<2x128xf32>
    %c3_175 = arith.constant 3 : index
    %c1_176 = arith.constant 1 : index
    %175 = memref.load %arg4[%c3_175, %c1_176] : memref<4x4xf32, #tpu.memory_space<smem>>
    %176 = vector.broadcast %175 : f32 to vector<2x128xf32>
    %177 = arith.mulf %174, %176 : vector<2x128xf32>
    %178 = arith.addf %172, %177 : vector<2x128xf32>
    %c0_177 = arith.constant 0 : index
    %c1_178 = arith.constant 1 : index
    %179 = memref.load %arg5[%c0_177, %c1_178] : memref<1x4xf32, #tpu.memory_space<smem>>
    %180 = vector.broadcast %179 : f32 to vector<2x128xf32>
    %181 = arith.addf %178, %180 : vector<2x128xf32>
    %c0_179 = arith.constant 0 : index
    %c1_180 = arith.constant 1 : index
    %c0_181 = arith.constant 0 : index
    %c0_182 = arith.constant 0 : index
    %182 = vector.load %arg6[%c0_179, %c1_180, %c0_181, %c0_182] : memref<1x4x2x128xf32, #tpu.memory_space<vmem>>, vector<1x1x2x128xf32>
    %183 = vector.shape_cast %182 : vector<1x1x2x128xf32> to vector<2x128xf32>
    %184 = arith.addf %181, %183 : vector<2x128xf32>
    %c0_183 = arith.constant 0 : index
    %c1_184 = arith.constant 1 : index
    %c0_185 = arith.constant 0 : index
    %c0_186 = arith.constant 0 : index
    %185 = vector.load %arg8[%c0_183, %c1_184, %c0_185, %c0_186] : memref<1x4x2x128xf32, #tpu.memory_space<vmem>>, vector<1x1x2x128xf32>
    %186 = vector.shape_cast %185 : vector<1x1x2x128xf32> to vector<2x128xf32>
    %187 = vector.shape_cast %184 : vector<2x128xf32> to vector<1x1x2x128xf32>
    tpu.vector_store %arg8[%c0_183, %c1_184, %c0_185, %c0_186], %187 {strides = array<i32>} : memref<1x4x2x128xf32, #tpu.memory_space<vmem>>, vector<1x1x2x128xf32>,
    %c0_187 = arith.constant 0 : index
    %c0_188 = arith.constant 0 : index
    %c0_189 = arith.constant 0 : index
    %c0_190 = arith.constant 0 : index
    %188 = vector.load %arg7[%c0_187, %c0_188, %c0_189, %c0_190] : memref<1x4x2x128xf32, #tpu.memory_space<vmem>>, vector<1x1x2x128xf32>
    %189 = vector.shape_cast %188 : vector<1x1x2x128xf32> to vector<2x128xf32>
    %c0_191 = arith.constant 0 : index
    %c2_192 = arith.constant 2 : index
    %190 = memref.load %arg4[%c0_191, %c2_192] : memref<4x4xf32, #tpu.memory_space<smem>>
    %191 = vector.broadcast %190 : f32 to vector<2x128xf32>
    %192 = arith.mulf %189, %191 : vector<2x128xf32>
    %c0_193 = arith.constant 0 : index
    %c1_194 = arith.constant 1 : index
    %c0_195 = arith.constant 0 : index
    %c0_196 = arith.constant 0 : index
    %193 = vector.load %arg7[%c0_193, %c1_194, %c0_195, %c0_196] : memref<1x4x2x128xf32, #tpu.memory_space<vmem>>, vector<1x1x2x128xf32>
    %194 = vector.shape_cast %193 : vector<1x1x2x128xf32> to vector<2x128xf32>
    %c1_197 = arith.constant 1 : index
    %c2_198 = arith.constant 2 : index
    %195 = memref.load %arg4[%c1_197, %c2_198] : memref<4x4xf32, #tpu.memory_space<smem>>
    %196 = vector.broadcast %195 : f32 to vector<2x128xf32>
    %197 = arith.mulf %194, %196 : vector<2x128xf32>
    %198 = arith.addf %192, %197 : vector<2x128xf32>
    %c0_199 = arith.constant 0 : index
    %c2_200 = arith.constant 2 : index
    %c0_201 = arith.constant 0 : index
    %c0_202 = arith.constant 0 : index
    %199 = vector.load %arg7[%c0_199, %c2_200, %c0_201, %c0_202] : memref<1x4x2x128xf32, #tpu.memory_space<vmem>>, vector<1x1x2x128xf32>
    %200 = vector.shape_cast %199 : vector<1x1x2x128xf32> to vector<2x128xf32>
    %c2_203 = arith.constant 2 : index
    %c2_204 = arith.constant 2 : index
    %201 = memref.load %arg4[%c2_203, %c2_204] : memref<4x4xf32, #tpu.memory_space<smem>>
    %202 = vector.broadcast %201 : f32 to vector<2x128xf32>
    %203 = arith.mulf %200, %202 : vector<2x128xf32>
    %204 = arith.addf %198, %203 : vector<2x128xf32>
    %c0_205 = arith.constant 0 : index
    %c3_206 = arith.constant 3 : index
    %c0_207 = arith.constant 0 : index
    %c0_208 = arith.constant 0 : index
    %205 = vector.load %arg7[%c0_205, %c3_206, %c0_207, %c0_208] : memref<1x4x2x128xf32, #tpu.memory_space<vmem>>, vector<1x1x2x128xf32>
    %206 = vector.shape_cast %205 : vector<1x1x2x128xf32> to vector<2x128xf32>
    %c3_209 = arith.constant 3 : index
    %c2_210 = arith.constant 2 : index
    %207 = memref.load %arg4[%c3_209, %c2_210] : memref<4x4xf32, #tpu.memory_space<smem>>
    %208 = vector.broadcast %207 : f32 to vector<2x128xf32>
    %209 = arith.mulf %206, %208 : vector<2x128xf32>
    %210 = arith.addf %204, %209 : vector<2x128xf32>
    %c0_211 = arith.constant 0 : index
    %c2_212 = arith.constant 2 : index
    %211 = memref.load %arg5[%c0_211, %c2_212] : memref<1x4xf32, #tpu.memory_space<smem>>
    %212 = vector.broadcast %211 : f32 to vector<2x128xf32>
    %213 = arith.addf %210, %212 : vector<2x128xf32>
    %c0_213 = arith.constant 0 : index
    %c2_214 = arith.constant 2 : index
    %c0_215 = arith.constant 0 : index
    %c0_216 = arith.constant 0 : index
    %214 = vector.load %arg6[%c0_213, %c2_214, %c0_215, %c0_216] : memref<1x4x2x128xf32, #tpu.memory_space<vmem>>, vector<1x1x2x128xf32>
    %215 = vector.shape_cast %214 : vector<1x1x2x128xf32> to vector<2x128xf32>
    %216 = arith.addf %213, %215 : vector<2x128xf32>
    %c0_217 = arith.constant 0 : index
    %c2_218 = arith.constant 2 : index
    %c0_219 = arith.constant 0 : index
    %c0_220 = arith.constant 0 : index
    %217 = vector.load %arg8[%c0_217, %c2_218, %c0_219, %c0_220] : memref<1x4x2x128xf32, #tpu.memory_space<vmem>>, vector<1x1x2x128xf32>
    %218 = vector.shape_cast %217 : vector<1x1x2x128xf32> to vector<2x128xf32>
    %219 = vector.shape_cast %216 : vector<2x128xf32> to vector<1x1x2x128xf32>
    tpu.vector_store %arg8[%c0_217, %c2_218, %c0_219, %c0_220], %219 {strides = array<i32>} : memref<1x4x2x128xf32, #tpu.memory_space<vmem>>, vector<1x1x2x128xf32>,
    %c0_221 = arith.constant 0 : index
    %c0_222 = arith.constant 0 : index
    %c0_223 = arith.constant 0 : index
    %c0_224 = arith.constant 0 : index
    %220 = vector.load %arg7[%c0_221, %c0_222, %c0_223, %c0_224] : memref<1x4x2x128xf32, #tpu.memory_space<vmem>>, vector<1x1x2x128xf32>
    %221 = vector.shape_cast %220 : vector<1x1x2x128xf32> to vector<2x128xf32>
    %c0_225 = arith.constant 0 : index
    %c3_226 = arith.constant 3 : index
    %222 = memref.load %arg4[%c0_225, %c3_226] : memref<4x4xf32, #tpu.memory_space<smem>>
    %223 = vector.broadcast %222 : f32 to vector<2x128xf32>
    %224 = arith.mulf %221, %223 : vector<2x128xf32>
    %c0_227 = arith.constant 0 : index
    %c1_228 = arith.constant 1 : index
    %c0_229 = arith.constant 0 : index
    %c0_230 = arith.constant 0 : index
    %225 = vector.load %arg7[%c0_227, %c1_228, %c0_229, %c0_230] : memref<1x4x2x128xf32, #tpu.memory_space<vmem>>, vector<1x1x2x128xf32>
    %226 = vector.shape_cast %225 : vector<1x1x2x128xf32> to vector<2x128xf32>
    %c1_231 = arith.constant 1 : index
    %c3_232 = arith.constant 3 : index
    %227 = memref.load %arg4[%c1_231, %c3_232] : memref<4x4xf32, #tpu.memory_space<smem>>
    %228 = vector.broadcast %227 : f32 to vector<2x128xf32>
    %229 = arith.mulf %226, %228 : vector<2x128xf32>
    %230 = arith.addf %224, %229 : vector<2x128xf32>
    %c0_233 = arith.constant 0 : index
    %c2_234 = arith.constant 2 : index
    %c0_235 = arith.constant 0 : index
    %c0_236 = arith.constant 0 : index
    %231 = vector.load %arg7[%c0_233, %c2_234, %c0_235, %c0_236] : memref<1x4x2x128xf32, #tpu.memory_space<vmem>>, vector<1x1x2x128xf32>
    %232 = vector.shape_cast %231 : vector<1x1x2x128xf32> to vector<2x128xf32>
    %c2_237 = arith.constant 2 : index
    %c3_238 = arith.constant 3 : index
    %233 = memref.load %arg4[%c2_237, %c3_238] : memref<4x4xf32, #tpu.memory_space<smem>>
    %234 = vector.broadcast %233 : f32 to vector<2x128xf32>
    %235 = arith.mulf %232, %234 : vector<2x128xf32>
    %236 = arith.addf %230, %235 : vector<2x128xf32>
    %c0_239 = arith.constant 0 : index
    %c3_240 = arith.constant 3 : index
    %c0_241 = arith.constant 0 : index
    %c0_242 = arith.constant 0 : index
    %237 = vector.load %arg7[%c0_239, %c3_240, %c0_241, %c0_242] : memref<1x4x2x128xf32, #tpu.memory_space<vmem>>, vector<1x1x2x128xf32>
    %238 = vector.shape_cast %237 : vector<1x1x2x128xf32> to vector<2x128xf32>
    %c3_243 = arith.constant 3 : index
    %c3_244 = arith.constant 3 : index
    %239 = memref.load %arg4[%c3_243, %c3_244] : memref<4x4xf32, #tpu.memory_space<smem>>
    %240 = vector.broadcast %239 : f32 to vector<2x128xf32>
    %241 = arith.mulf %238, %240 : vector<2x128xf32>
    %242 = arith.addf %236, %241 : vector<2x128xf32>
    %c0_245 = arith.constant 0 : index
    %c3_246 = arith.constant 3 : index
    %243 = memref.load %arg5[%c0_245, %c3_246] : memref<1x4xf32, #tpu.memory_space<smem>>
    %244 = vector.broadcast %243 : f32 to vector<2x128xf32>
    %245 = arith.addf %242, %244 : vector<2x128xf32>
    %c0_247 = arith.constant 0 : index
    %c3_248 = arith.constant 3 : index
    %c0_249 = arith.constant 0 : index
    %c0_250 = arith.constant 0 : index
    %246 = vector.load %arg6[%c0_247, %c3_248, %c0_249, %c0_250] : memref<1x4x2x128xf32, #tpu.memory_space<vmem>>, vector<1x1x2x128xf32>
    %247 = vector.shape_cast %246 : vector<1x1x2x128xf32> to vector<2x128xf32>
    %248 = arith.addf %245, %247 : vector<2x128xf32>
    %c0_251 = arith.constant 0 : index
    %c3_252 = arith.constant 3 : index
    %c0_253 = arith.constant 0 : index
    %c0_254 = arith.constant 0 : index
    %249 = vector.load %arg8[%c0_251, %c3_252, %c0_253, %c0_254] : memref<1x4x2x128xf32, #tpu.memory_space<vmem>>, vector<1x1x2x128xf32>
    %250 = vector.shape_cast %249 : vector<1x1x2x128xf32> to vector<2x128xf32>
    %251 = vector.shape_cast %248 : vector<2x128xf32> to vector<1x1x2x128xf32>
    tpu.vector_store %arg8[%c0_251, %c3_252, %c0_253, %c0_254], %251 {strides = array<i32>} : memref<1x4x2x128xf32, #tpu.memory_space<vmem>>, vector<1x1x2x128xf32>,
    return
  }
  func.func @transform_0(%arg0: i32, %arg1: i32) -> (i32, i32) {
    %c0_i32 = arith.constant 0 : i32
    %c0_i32_0 = arith.constant 0 : i32
    %c0_i32_1 = arith.constant 0 : i32
    return %c0_i32, %c0_i32_0 : i32, i32
  }
  func.func @transform_1(%arg0: i32, %arg1: i32) -> (i32, i32) {
    %c0_i32 = arith.constant 0 : i32
    %c0_i32_0 = arith.constant 0 : i32
    %c0_i32_1 = arith.constant 0 : i32
    return %c0_i32, %c0_i32_0 : i32, i32
  }
  func.func @transform_2(%arg0: i32, %arg1: i32) -> (i32, i32) {
    %c0_i32 = arith.constant 0 : i32
    %c0_i32_0 = arith.constant 0 : i32
    %c0_i32_1 = arith.constant 0 : i32
    return %c0_i32, %c0_i32_0 : i32, i32
  }
  func.func @transform_3(%arg0: i32, %arg1: i32) -> (i32, i32) {
    %c0_i32 = arith.constant 0 : i32
    %c0_i32_0 = arith.constant 0 : i32
    %c0_i32_1 = arith.constant 0 : i32
    return %c0_i32, %c0_i32_0 : i32, i32
  }
  func.func @transform_4(%arg0: i32, %arg1: i32) -> (i32, i32, i32, i32) {
    %c0_i32 = arith.constant 0 : i32
    %c0_i32_0 = arith.constant 0 : i32
    %c0_i32_1 = arith.constant 0 : i32
    return %arg0, %c0_i32, %arg1, %c0_i32_0 : i32, i32, i32, i32
  }
  func.func @transform_5(%arg0: i32, %arg1: i32) -> (i32, i32, i32, i32) {
    %c0_i32 = arith.constant 0 : i32
    %c0_i32_0 = arith.constant 0 : i32
    %c0_i32_1 = arith.constant 0 : i32
    return %arg0, %c0_i32, %arg1, %c0_i32_0 : i32, i32, i32, i32
  }
  func.func @transform_6(%arg0: i32, %arg1: i32) -> (i32, i32, i32, i32) {
    %c0_i32 = arith.constant 0 : i32
    %c0_i32_0 = arith.constant 0 : i32
    %c0_i32_1 = arith.constant 0 : i32
    return %arg0, %c0_i32, %arg1, %c0_i32_0 : i32, i32, i32, i32
  }
}

</mosaic_0001>

<bundles_post_ra>
// kernel: tpu_custom_call.1
= control target key start
LH: loop header
LB: loop body
LE: loop exit
PB: predicated region body
PF: predicated region fallthrough
CT: control target
= control target key end

     0   :  { %s1564_s0 = inlined_call_operand.hbm [shape: f32[4,4], index: 0, kind: input, shape index: {}]   ;;  %s1565_s1 = inlined_call_operand.hbm [shape: f32[1,4], index: 1, kind: input, shape index: {}]   ;;  %s1566_s2 = inlined_call_operand.hbm [shape: f32[4,4], index: 2, kind: input, shape index: {}]   ;;  %s1567_s3 = inlined_call_operand.vmem [shape: f32[1,4], index: 3, kind: input, shape index: {}]   ;;  %s1568_s4 = inlined_call_operand.hbm [shape: f32[2,4,2,128], index: 4, kind: input, shape index: {}]   ;;  %s1569_s5 = inlined_call_operand.hbm [shape: f32[2,4,2,128], index: 5, kind: output, shape index: {0}]   ;;  %s1570_s6 = inlined_call_operand.hbm [shape: f32[2,4,2,128], index: 6, kind: output, shape index: {1}]  }
   0x1   :  { %1572 = sst [smem:[#allocation22_spill]] %s1564_s0 }
   0x2   :  { %1573 = sst [smem:[#allocation23_spill]] %s1565_s1 }
   0x3   :  { %1574 = sst [smem:[#allocation24_spill]] %s1566_s2 }
   0x4   :  { %1575 = sst [smem:[#allocation25_spill]] %s1567_s3 }
   0x5   :  { %1576 = sst [smem:[#allocation26_spill]] %s1568_s4 }
   0x6   :  { %12 = vsyncpa [#allocation5], 0 }
   0x7   :  { %13 = vsyncpa [#allocation8], 0 }
   0x8   :  { %14 = vsyncpa [#allocation6], 0 }
   0x9   :  { %15 = vsyncpa [#allocation3], 0 }
   0xa   :  { %17 = vsyncpa [#allocation3 + $0x1], 0 }
   0xb   :  { %18 = vsyncpa [#allocation4], 0 }
   0xc   :  { %20 = vsyncpa [#allocation4 + $0x1], 0 }
   0xd   :  { %21 = vsyncpa [#allocation14], 0 }
   0xe   :  { %23 = vsyncpa [#allocation14 + $0x1], 0  ;;  %s1234_s21 = smov 0   ;;  %s1236_s22 = smov 0  }
   0xf   :  { %s1238_s23 = smov 0   ;;  %s1240_s24 = smov 0  }
  0x10   :  { %s1242_s25 = smov 0   ;;  %s1244_s26 = smov 0  }
  0x11 LB: > { %s762_s27 = sadd.s32 4294967295, %s1189_s26   ;;  %s763_s28 = sadd.s32 4294967294, %s1189_s26   ;;  %s1189_s26 = sphi %s1244_s26, %s29_s26   ;;  %s1185_s25 = sphi %s1242_s25, %s1595_s25   ;;  %s1181_s24 = sphi %s1240_s24, %s1594_s24   ;;  %s1177_s23 = sphi %s1238_s23, %s1593_s23   ;;  %s1173_s22 = sphi %s1236_s22, %s1592_s22   ;;  %s1169_s21 = sphi %s1234_s21, %s1591_s21  }
  0x12   : > { %p147_p0 = scmp.ne.s32.totalorder %s1173_s22, %s1169_s21  ;;  %p1268_p1 = scmp.eq.s32.totalorder %s762_s27, 0 }
  0x13   : > { %p1272_p2 = scmp.eq.s32.totalorder %s762_s27, 1  ;;  %p179_p3 = scmp.eq.s32.totalorder %s763_s28, 1 }
  0x14   : > { %p1278_p4 = por %p1268_p1, %p147_p0  ;;  %p764_p5 = scmp.ge.s32.totalorder %s1189_s26, 1 }
  0x15   : > { %p1283_p6 = por %p179_p3, %p147_p0  ;;  %p214_p7 = scmp.lt.s32.totalorder %s1189_s26, 3 }
  0x16   : > { %s1581_s1 = sld [smem:[#allocation23_spill]]  ;;  %p769_p9 = scmp.ge.s32.totalorder %s1189_s26, 2 }
  0x17   : > { %p1291_p8 = pnand %p764_p5, %p214_p7  ;;  %s1583_s0 = sld [smem:[#allocation22_spill]] }
  0x18   : > { %s1584_s2 = sld [smem:[#allocation24_spill]]  ;;  %s1191_s19 = smov [#allocation7]  }
  0x19   : > { %p883_p10 = pneg %p1291_p8  ;;  %s1192_s20 = smov [#allocation2]  }
  0x1a   : > { %s1585_s3 = sld [smem:[#allocation25_spill]]  ;;  %s1193_s10 = smov [#allocation9]  }
  0x1b   : > { %p884_p11 = pnand %p883_p10, %p1268_p1  ;;  %s1194_s13 = smov [#allocation10]  }
  0x1c   : > { %s236_s11 = sshll.u32 %s1581_s1, 4  ;;  %s41_s14 = sadd.s32 1, %s1185_s25  ;;  %s237_s11 = int_to_ptr.hbm [resolvable:$true] %s236_s11 }
  0x1d   : > { %s226_s15 = sshll.u32 %s1583_s0, 4  ;;  %s134_s16 = sadd.s32 1, %s1177_s23  ;;  %s227_s15 = int_to_ptr.hbm [resolvable:$true] %s226_s15 }
  0x1e   : > { %s246_s18 = sshll.u32 %s1584_s2, 4  ;;  %p43_p12 = scmp.ge.s32.totalorder %s41_s14, 2  ;;  %s247_s18 = int_to_ptr.hbm [resolvable:$true] %s246_s18 }
  0x1f   : > { %889 = dma.hbm_to_smem (!%p884_p11), %s237_s11, 16, %s1191_s19, [#allocation8]  }
  0x20   : > { %886 = dma.hbm_to_smem (!%p884_p11), %s227_s15, 64, %s1192_s20, [#allocation5]  }
  0x21   : > { %s256_s9 = sshll.u32 %s1585_s3, 4  ;;  %p141_p13 = scmp.ne.s32.totalorder %s1177_s23, %s1173_s22  ;;  %s257_s9 = int_to_ptr.vmem [resolvable:$true] %s256_s9 }
  0x22   : > { %892 = dma.hbm_to_smem (!%p884_p11), %s247_s18, 64, %s1193_s10, [#allocation8]  }
  0x23   : > { %895 = dma.vmem_to_smem (!%p884_p11), %s257_s9, 16, %s1194_s13, [#allocation6]  }
  0x24   : > { %p142_p0 = scmp.eq.s32.totalorder %s1189_s26, 0  ;;  %p911_p3 = scmp.lt.s32.totalorder %s1189_s26, 2 }
  0x25   : > { %s1597_s14 = smov (%p43_p12, %s41_s14), 0  ;;  %p1323_p7 = por %p1272_p2, %p141_p13 }
  0x26   : > { %1586 = sst [smem:[#allocation21_spill]] %s1597_s14  ;;  %p1317_p5 = por %p142_p0, %p141_p13 }
  0x27   : > { %s129_s17 = ssub.s32 %s1185_s25, %s1597_s14  ;;  %s267_s18 = sand.u32 1, %s1177_s23  }
  0x28   : > { %p132_p10 = scmp.eq.s32.totalorder %s129_s17, 0  ;;  %s770_s19 = sshll.u32 %s267_s18, 3 }
  0x29   : > { %s858_s20 = sshll.u32 %s1185_s25, 3  ;;  %s1589_s4 = sld [smem:[#allocation26_spill]] }
  0x2a   : > { %s1332_s27 = scalar_select %p132_p10, %s1177_s23, %s134_s16  }
  0x2b   : > { %s271_s0 = scalar_lea.vmem [#allocation11], %s770_s19  ;;  %p897_p2 = pnand %p911_p3, %p1317_p5 }
  0x2c   : > { %s280_s1 = sshll.u32 %s271_s0, 4  ;;  %s268_s30 = scalar_lea.sflag [#allocation3], %s267_s18  ;;  %s281_s1 = int_to_ptr.vmem [resolvable:$true] %s280_s1 }
  0x2d   : > { %s1195_s2 = smov 32   ;;  %s1196_s3 = smov 2  }
  0x2e   : > { %292 = sbr.rel (%p1291_p8) target bundleno = 127 (0x7f), region = 40 }
  0x2f   : > { %s277_s10 = scalar_lea.hbm %s1589_s4, %s858_s20 }
  0x30   : > { %s278_s13 = sshll.u32 %s277_s10, 4  ;;  %s279_s13 = int_to_ptr.hbm [resolvable:$true] %s278_s13 }
  0x31   : > { %899 = dma.hbm_to_vmem [thread:$0]  (!%p897_p2), %s279_s13, 128, %s281_s1, %s268_s30, %s1195_s2, %s1195_s2, %s1196_s3  }
  0x33   : > { %1144 = dma.done.wait (%p1268_p1), [#allocation5], 64  }
  0x34   : > { %1146 = vsyncadd (%p1268_p1), [#allocation5], 4294967232 }
  0x35   : > { %1148 = dma.done.wait (%p1268_p1), [#allocation8], 80  }
  0x36   : > { %1150 = vsyncadd (%p1268_p1), [#allocation8], 4294967216 }
  0x37   : > { %1152 = dma.done.wait (%p1268_p1), [#allocation6], 16  }
  0x38   : > { %1154 = vsyncadd (%p1268_p1), [#allocation6], 4294967280  ;;  %s1356_s0 = sand.u32 1, %s1173_s22  }
  0x39   : > { %s1359_s1 = sshll.u32 %s1356_s0, 3  ;;  %s315_s2 = scalar_lea.sflag [#allocation3], %s1356_s0 }
  0x3a   : > { %s1363_s3 = scalar_lea.vmem [#allocation11], %s1359_s1 }
  0x3b   : > { %1156 = dma.done.wait (%p1278_p4), %s315_s2, 128  }
  0x3c   : > { %1158 = vsyncadd (%p1278_p4), %s315_s2, 4294967168 }
  0x3d   : > { %324 = sfence }
  0x3e   : > { %s355_s29 = sld [smem:[#allocation2]]  ;;  %v354_v0 = vld [vmem:[%s1363_s3] sm:$0x3]  ;;  %v781_v1 = vld [vmem:[%s1363_s3 + $0x2] sm:$0x3] }
  0x3f   : > { %s782_s12 = sld [smem:[#allocation2 + $0x80]]  ;;  %v783_v3 = vld [vmem:[%s1363_s3 + $0x4] sm:$0x3]  ;;  %v785_v6 = vld [vmem:[%s1363_s3 + $0x6] sm:$0x3] }
  0x40   : > { %s784_s16 = sld [smem:[#allocation2 + $0x100]]  ;;  %v381_v11 = vld [vmem:[%s1363_s3] sm:$0x3]  ;;  %v788_v14 = vld [vmem:[%s1363_s3 + $0x2] sm:$0x3] }
  0x41   : > { %s786_s11 = sld [smem:[#allocation2 + $0x180]]  ;;  %v790_v16 = vld [vmem:[%s1363_s3 + $0x4] sm:$0x3]  ;;  %v792_v20 = vld [vmem:[%s1363_s3 + $0x6] sm:$0x3] }
  0x42   : > { %s1370_s17 = sld [smem:[#allocation7]]  ;;  %v406_v27 = vld [vmem:[%s1363_s3] sm:$0x3]  ;;  %v797_v30 = vld [vmem:[%s1363_s3 + $0x2] sm:$0x3] }
  0x43   : > { %s787_s18 = sld [smem:[#allocation2 + $0x1]]  ;;  %v799_v33 = vld [vmem:[%s1363_s3 + $0x4] sm:$0x3]  ;;  %v801_v37 = vld [vmem:[%s1363_s3 + $0x6] sm:$0x3] }
  0x44   : > { %v356_v2 = vstv %s355_s29  ;;  %s789_s7 = sld [smem:[#allocation2 + $0x81]]  ;;  %v431_v45 = vld [vmem:[%s1363_s3] sm:$0x3]  ;;  %v806_v48 = vld [vmem:[%s1363_s3 + $0x2] sm:$0x3] }
  0x45   : > { %v357_v4 = vmul.f32 %v356_v2, %v354_v0  ;;  %v361_v5 = vstv %s782_s12  ;;  %s791_s19 = sld [smem:[#allocation2 + $0x101]]  ;;  %v808_v51 = vld [vmem:[%s1363_s3 + $0x4] sm:$0x3]  ;;  %v810_v55 = vld [vmem:[%s1363_s3 + $0x6] sm:$0x3] }
  0x46   : > { %v362_v7 = vmul.f32 %v781_v1, %v361_v5  ;;  %v367_v8 = vstv %s784_s16  ;;  %s793_s20 = sld [smem:[#allocation2 + $0x181]] }
  0x47   : > { %v368_v9 = vmul.f32 %v783_v3, %v367_v8  ;;  %v373_v10 = vstv %s786_s11  ;;  %s1376_s28 = sld [smem:[#allocation7 + $0x1]] }
  0x48   : > { %v363_v12 = vadd.f32 %v362_v7, %v357_v4  ;;  %v374_v13 = vmul.f32 %v785_v6, %v373_v10  ;;  %s796_s9 = sld [smem:[#allocation2 + $0x2]]  ;;  %v377_v21 = vstv %s1370_s17  ;;  %s1403_s17 = scalar_lea.vmem [#allocation12], %s1359_s1 }
  0x49   : > { %v383_v15 = vstv %s787_s18  ;;  %s1380_s10 = sld [smem:[#allocation2 + $0x82]]  ;;  %s578_s4 = sshll.u32 %s1403_s17, 4  ;;  %s1487_s4 = int_to_ptr.vmem [resolvable:$true] %s578_s4 }
  0x4a   : > { %v369_v17 = vadd.f32 %v368_v9, %v363_v12  ;;  %v384_v18 = vmul.f32 %v383_v15, %v381_v11  ;;  %v387_v19 = vstv %s789_s7  ;;  %s800_s13 = sld [smem:[#allocation2 + $0x102]] }
  0x4b   : > { %v388_v22 = vmul.f32 %v788_v14, %v387_v19  ;;  %v392_v23 = vstv %s791_s19  ;;  %s1384_s30 = sld [smem:[#allocation2 + $0x182]] }
  0x4c   : > { %v375_v24 = vadd.f32 %v374_v13, %v369_v17  ;;  %v393_v25 = vmul.f32 %v790_v16, %v392_v23  ;;  %v397_v26 = vstv %s793_s20  ;;  %s1387_s2 = sld [smem:[#allocation7 + $0x2]] }
  0x4d   : > { %v389_v28 = vadd.f32 %v388_v22, %v384_v18  ;;  %v398_v29 = vmul.f32 %v792_v20, %v397_v26  ;;  %s805_s29 = sld [smem:[#allocation2 + $0x3]]  ;;  %v401_v39 = vstv %s1376_s28 }
  0x4e   : > { %v378_v31 = vadd.f32 %v377_v21, %v375_v24  ;;  %v408_v32 = vstv %s796_s9  ;;  %s1391_s12 = sld [smem:[#allocation2 + $0x83]] }
  0x4f   : > { %v394_v34 = vadd.f32 %v393_v25, %v389_v28  ;;  %v409_v35 = vmul.f32 %v408_v32, %v406_v27  ;;  %v412_v36 = vstv %s1380_s10  ;;  %s1395_s16 = sld [smem:[#allocation2 + $0x103]] }
  0x50   : > { %v379_v38 = vmax.f32 %v378_v31, 0.0  ;;  %v413_v40 = vmul.f32 %v797_v30, %v412_v36  ;;  %v417_v41 = vstv %s800_s13  ;;  %s1398_s11 = sld [smem:[#allocation2 + $0x183]] }
  0x51   : > { %v399_v42 = vadd.f32 %v398_v29, %v394_v34  ;;  %v418_v43 = vmul.f32 %v799_v33, %v417_v41  ;;  %v422_v44 = vstv %s1384_s30  ;;  %s1407_s18 = sld [smem:[#allocation7 + $0x3]] }
  0x52   : > { %380 = vst [vmem:[%s1403_s17] sm:$0x3] %v379_v38  ;;  %v414_v46 = vadd.f32 %v413_v40, %v409_v35  ;;  %v423_v47 = vmul.f32 %v801_v37, %v422_v44  ;;  %s1410_s7 = sld [smem:[#allocation9]]  ;;  %v426_v57 = vstv %s1387_s2 }
  0x53   : > { %v402_v49 = vadd.f32 %v401_v39, %v399_v42  ;;  %v433_v50 = vstv %s805_s29  ;;  %s1414_s19 = sld [smem:[#allocation9 + $0x80]] }
  0x54   : > { %v419_v52 = vadd.f32 %v418_v43, %v414_v46  ;;  %v434_v53 = vmul.f32 %v433_v50, %v431_v45  ;;  %v437_v54 = vstv %s1391_s12  ;;  %s1418_s20 = sld [smem:[#allocation9 + $0x100]] }
  0x55   : > { %v403_v56 = vmax.f32 %v402_v49, 0.0  ;;  %v438_v58 = vmul.f32 %v806_v48, %v437_v54  ;;  %v442_v59 = vstv %s1395_s16  ;;  %s1421_s28 = sld [smem:[#allocation9 + $0x180]] }
  0x56   : > { %v424_v60 = vadd.f32 %v423_v47, %v419_v52  ;;  %v443_v61 = vmul.f32 %v808_v51, %v442_v59  ;;  %v447_v62 = vstv %s1398_s11  ;;  %s820_s9 = sld [smem:[#allocation9 + $0x1]] }
  0x57   : > { %795 = vst [vmem:[%s1403_s17 + $0x2] sm:$0x3] %v403_v56  ;;  %v439_v63 = vadd.f32 %v438_v58, %v434_v53  ;;  %v448_v0 = vmul.f32 %v810_v55, %v447_v62  ;;  %s822_s10 = sld [smem:[#allocation9 + $0x81]]  ;;  %v451_v4 = vstv %s1407_s18  ;;  %s859_s18 = sshll.u32 %s1181_s24, 3  ;;  %v478_v56 = vld [vmem:[%s1363_s3] sm:$0x3] }
  0x58   : > { %v427_v1 = vadd.f32 %v426_v57, %v424_v60  ;;  %s1424_s13 = sld [smem:[#allocation9 + $0x101]]  ;;  %v458_v7 = vstv %s1410_s7  ;;  %s1461_s14 = scalar_lea.hbm %s1569_s5, %s859_s18 }
  0x59   : > { %v444_v2 = vadd.f32 %v443_v61, %v439_v63  ;;  %s1427_s30 = sld [smem:[#allocation10]]  ;;  %v456_v6 = vld [vmem:[%s1403_s17] sm:$0x3]  ;;  %v462_v8 = vstv %s1414_s19 }
  0x5a   : > { %v428_v3 = vmax.f32 %v427_v1, 0.0  ;;  %s1431_s2 = sld [smem:[#allocation9 + $0x181]]  ;;  %v481_v9 = vld [vmem:[%s1403_s17] sm:$0x3]  ;;  %v459_v12 = vmul.f32 %v458_v7, %v456_v6  ;;  %v467_v21 = vstv %s1418_s20 }
  0x5b   : > { %v449_v5 = vadd.f32 %v448_v0, %v444_v2  ;;  %s830_s29 = sld [smem:[#allocation9 + $0x2]]  ;;  %v507_v20 = vld [vmem:[%s1403_s17] sm:$0x3]  ;;  %v472_v35 = vstv %s1421_s28  ;;  %s560_s28 = scalar_lea.sflag [#allocation4], %s1356_s0 }
  0x5c   : > { %804 = vst [vmem:[%s1403_s17 + $0x4] sm:$0x3] %v428_v3  ;;  %v483_v11 = vstv %s820_s9  ;;  %s1436_s12 = sld [smem:[#allocation9 + $0x82]]  ;;  %v533_v41 = vld [vmem:[%s1403_s17] sm:$0x3] }
  0x5d   : > { %v452_v10 = vadd.f32 %v451_v4, %v449_v5  ;;  %v487_v15 = vstv %s822_s10  ;;  %s1440_s16 = sld [smem:[#allocation10 + $0x1]]  ;;  %v484_v18 = vmul.f32 %v483_v11, %v481_v9 }
  0x5e   : > { %v814_v13 = vld [vmem:[%s1403_s17 + $0x2] sm:$0x3]  ;;  %s1442_s11 = sld [smem:[#allocation9 + $0x102]]  ;;  %v492_v22 = vstv %s1424_s13 }
  0x5f   : > { %v821_v14 = vld [vmem:[%s1403_s17 + $0x2] sm:$0x3]  ;;  %v453_v16 = vmax.f32 %v452_v10, 0.0  ;;  %v463_v17 = vmul.f32 %v814_v13, %v462_v8  ;;  %s1446_s7 = sld [smem:[#allocation9 + $0x182]]  ;;  %v476_v37 = vstv %s1427_s30 }
  0x60   : > { %v488_v19 = vmul.f32 %v821_v14, %v487_v15  ;;  %v831_v23 = vld [vmem:[%s1403_s17 + $0x2] sm:$0x3]  ;;  %s1452_s19 = sld [smem:[#allocation10 + $0x2]]  ;;  %v497_v38 = vstv %s1431_s2 }
  0x61   : > { %813 = vst [vmem:[%s1403_s17 + $0x6] sm:$0x3] %v453_v16  ;;  %v509_v24 = vstv %s830_s29  ;;  %s1454_s9 = sld [smem:[#allocation9 + $0x3]]  ;;  %v464_v25 = vadd.f32 %v463_v17, %v459_v12  ;;  %s580_s29 = sshll.u32 %s1461_s14, 4  ;;  %v841_v46 = vld [vmem:[%s1403_s17 + $0x2] sm:$0x3]  ;;  %s1489_s29 = int_to_ptr.hbm [resolvable:$true] %s580_s29 }
  0x62   : > { %v489_v27 = vadd.f32 %v488_v19, %v484_v18  ;;  %v510_v29 = vmul.f32 %v509_v24, %v507_v20  ;;  %v513_v30 = vstv %s1436_s12  ;;  %s1467_s20 = sld [smem:[#allocation9 + $0x83]]  ;;  %s1077_s30 = sshra.s32 %s1489_s29, 4  ;;  %s1078_s30 = int_to_ptr.hbm [resolvable:$true] %s1077_s30 }
  0x63   : > { %v816_v26 = vld [vmem:[%s1403_s17 + $0x4] sm:$0x3]  ;;  %v514_v34 = vmul.f32 %v831_v23, %v513_v30  ;;  %s1472_s13 = sld [smem:[#allocation9 + $0x103]]  ;;  %v501_v44 = vstv %s1440_s16  ;;  %s1079_s2 = scalar_lea.hbm %s1078_s30, 8 }
  0x64   : > { %v823_v28 = vld [vmem:[%s1403_s17 + $0x4] sm:$0x3]  ;;  %v468_v32 = vmul.f32 %v816_v26, %v467_v21  ;;  %v518_v36 = vstv %s1442_s11  ;;  %s1478_s12 = sld [smem:[#allocation9 + $0x183]]  ;;  %p1080_p1 = scmp.ne.s32.totalorder %s1078_s30, %s1079_s2 }
  0x65   : > { %v833_v31 = vld [vmem:[%s1403_s17 + $0x4] sm:$0x3]  ;;  %v493_v33 = vmul.f32 %v823_v28, %v492_v22  ;;  %v515_v39 = vadd.f32 %v514_v34, %v510_v29  ;;  %v523_v45 = vstv %s1446_s7  ;;  %s1491_s14 = sld [smem:[#allocation10 + $0x3]]  ;;  %s1083_s7 = scalar_lea.hbm %s1569_s5, 16 }
  0x66   : > { %v519_v40 = vmul.f32 %v833_v31, %v518_v36  ;;  %v469_v42 = vadd.f32 %v468_v32, %v464_v25  ;;  %v527_v57 = vstv %s1452_s19  ;;  %v843_v59 = vld [vmem:[%s1403_s17 + $0x4] sm:$0x3]  ;;  %p1081_p4 = pnand %p1080_p1, %p1323_p7  ;;  %p1084_p11 = scmp.lt.s32.totalorder %s1078_s30, %s1569_s5 }
  0x67   : > { %v494_v43 = vadd.f32 %v493_v33, %v489_v27  ;;  %v535_v51 = vstv %s1454_s9  ;;  %p1085_p12 = scmp.lt.s32.totalorder %s1083_s7, %s1079_s2 }
  0x68   : > { %v818_v47 = vld [vmem:[%s1403_s17 + $0x6] sm:$0x3]  ;;  %v520_v49 = vadd.f32 %v519_v40, %v515_v39  ;;  %v536_v55 = vmul.f32 %v535_v51, %v533_v41  ;;  %v539_v58 = vstv %s1467_s20  ;;  %p1082_p8 = pneg %p1081_p4 }
  0x69   : > { %v825_v48 = vld [vmem:[%s1403_s17 + $0x6] sm:$0x3]  ;;  %v473_v52 = vmul.f32 %v818_v47, %v472_v35  ;;  %v540_v0 = vmul.f32 %v841_v46, %v539_v58  ;;  %p1086_p13 = por %p1085_p12, %p1084_p11 }
  0x6a   : > { %v835_v50 = vld [vmem:[%s1403_s17 + $0x6] sm:$0x3]  ;;  %v498_v53 = vmul.f32 %v825_v48, %v497_v38 }
  0x6b   : > { %v524_v54 = vmul.f32 %v835_v50, %v523_v45  ;;  %v845_v60 = vld [vmem:[%s1403_s17 + $0x6] sm:$0x3]  ;;  %v474_v61 = vadd.f32 %v473_v52, %v469_v42  ;;  %p1087_p0 = pnand %p1086_p13, %p1082_p8 }
  0x6c   : > { %v499_v62 = vadd.f32 %v498_v53, %v494_v43 }
  0x6d   : > { %v525_v63 = vadd.f32 %v524_v54, %v520_v49 }
  0x6e   : > { %1090 = shalt.err (!%p1087_p0)
}
  0x6f   : > { %s1197_s17 = smov 32   ;;  %s1198_s10 = smov 2   ;;  %v828_v1 = vld [vmem:[%s1363_s3 + $0x2] sm:$0x3]  ;;  %v838_v2 = vld [vmem:[%s1363_s3 + $0x4] sm:$0x3]  ;;  %v544_v3 = vstv %s1472_s13  ;;  %v549_v4 = vstv %s1478_s12  ;;  %v477_v5 = vadd.f32 %v476_v37, %v474_v61  ;;  %v502_v6 = vadd.f32 %v501_v44, %v499_v62 }
  0x70   : > { %879 = dma.vmem_to_hbm [thread:$0]  (%p1323_p7), %s1487_s4, 128, %s1489_s29, %s560_s28, %s1197_s17, %s1197_s17, %s1198_s10   ;;  %v528_v7 = vadd.f32 %v527_v57, %v525_v63  ;;  %v541_v8 = vadd.f32 %v540_v0, %v536_v55  ;;  %v545_v9 = vmul.f32 %v843_v59, %v544_v3  ;;  %v550_v10 = vmul.f32 %v845_v60, %v549_v4 }
  0x71   : > { %v479_v11 = vadd.f32 %v478_v56, %v477_v5  ;;  %v504_v12 = vadd.f32 %v828_v1, %v502_v6  ;;  %s595_s29 = scalar_lea.hbm %s1570_s6, %s859_s18  ;;  %s353_s28 = scalar_lea.vmem [#allocation13], %s1359_s1  ;;  %v553_v15 = vstv %s1491_s14  ;;  %v848_v17 = vld [vmem:[%s1363_s3 + $0x6] sm:$0x3] }
  0x72   : > { %v530_v13 = vadd.f32 %v838_v2, %v528_v7  ;;  %v546_v14 = vadd.f32 %v545_v9, %v541_v8  ;;  %s596_s13 = sshll.u32 %s353_s28, 4  ;;  %s598_s12 = sshll.u32 %s595_s29, 4  ;;  %s597_s13 = int_to_ptr.vmem [resolvable:$true] %s596_s13  ;;  %s599_s12 = int_to_ptr.hbm [resolvable:$true] %s598_s12 }
  0x73   : > { %480 = vst [vmem:[%s353_s28] sm:$0x3] %v479_v11  ;;  %s565_s24 = scalar_lea.sflag [#allocation14], %s1356_s0  ;;  %s1105_s30 = sshra.s32 %s599_s12, 4  ;;  %s1106_s30 = int_to_ptr.hbm [resolvable:$true] %s1105_s30 }
  0x74   : > { %829 = vst [vmem:[%s353_s28 + $0x2] sm:$0x3] %v504_v12  ;;  %v551_v16 = vadd.f32 %v550_v10, %v546_v14  ;;  %s1107_s2 = scalar_lea.hbm %s1106_s30, 8  ;;  %s1111_s14 = scalar_lea.hbm %s1570_s6, 16 }
  0x75   : > { %839 = vst [vmem:[%s353_s28 + $0x4] sm:$0x3] %v530_v13  ;;  %p1108_p3 = scmp.ne.s32.totalorder %s1106_s30, %s1107_s2  ;;  %p1112_p2 = scmp.lt.s32.totalorder %s1106_s30, %s1570_s6 }
  0x76   : > { %v554_v18 = vadd.f32 %v553_v15, %v551_v16  ;;  %p1113_p1 = scmp.lt.s32.totalorder %s1111_s14, %s1107_s2 }
  0x77   : > { %p1109_p5 = pnand %p1108_p3, %p1323_p7 }
  0x78   : > { %v556_v19 = vadd.f32 %v848_v17, %v554_v18  ;;  %p1114_p4 = por %p1113_p1, %p1112_p2 }
  0x79   : > { %p1110_p10 = pneg %p1109_p5 }
  0x7a   : > { %849 = vst [vmem:[%s353_s28 + $0x6] sm:$0x3] %v556_v19 }
  0x7b   : > { %p1115_p8 = pnand %p1114_p4, %p1110_p10 }
  0x7d   : > { %1118 = shalt.err (!%p1115_p8)
}
  0x7e   : > { %880 = dma.vmem_to_hbm [thread:$0]  (%p1323_p7), %s597_s13, 128, %s599_s12, %s565_s24, %s1197_s17, %s1197_s17, %s1198_s10  }
  0x7f PF: > { %s613_s0 = sand.u32 1, %s1169_s21   ;;  %p901_p11 = pnand %p769_p9, %p1283_p6 }
  0x80   : > { %s614_s11 = scalar_lea.sflag [#allocation4], %s613_s0 }
  0x81   : > { %p902_p12 = pneg %p901_p11 }
  0x83   : > { %1160 = dma.done.wait (%p902_p12), %s614_s11, 128  }
  0x84   : > { %1162 = vsyncadd (%p902_p12), %s614_s11, 4294967168  ;;  %s624_s7 = scalar_lea.sflag [#allocation14], %s613_s0 }
  0x85   : > { %1164 = dma.done.wait (%p902_p12), %s624_s7, 128  }
  0x86   : > { %1166 = vsyncadd (%p902_p12), %s624_s7, 4294967168  ;;  %s29_s26 = sadd.s32 1, %s1189_s26   ;;  %s1590_s15 = sld [smem:[#allocation21_spill]] }
  0x87   : > { %p26_p13 = scmp.ge.s32.totalorder %s29_s26, 4   ;;  %s1591_s21 = smov %s1173_s22 }
  0x88   : > { %s1592_s22 = smov %s1177_s23  ;;  %s1593_s23 = smov %s1332_s27 }
  0x89   : > { %s1594_s24 = smov %s1185_s25  ;;  %28 = sbr.rel (!%p26_p13) target bundleno = 17 (0x11), region = 129 }
  0x8c   : > { %s1595_s25 = smov %s1590_s15 }
  0x8e   :  { %630 = vsyncpa [#allocation3], 1 }
  0x8f   :  { %632 = vsyncpa [#allocation3 + $0x1], 1 }
  0x90   :  { %633 = vsyncpa [#allocation4], 1 }
  0x91   :  { %635 = vsyncpa [#allocation4 + $0x1], 1 }
  0x92   :  { %636 = vsyncpa [#allocation14], 1 }
  0x93   :  { %638 = vsyncpa [#allocation14 + $0x1], 1 }
  0x94   :  { %639 = vsyncpa [#allocation5], 1 }
  0x95   :  { %641 = vsyncpa [#allocation5 + $0x1], 1 }
  0x96   :  { %642 = vsyncpa [#allocation8], 1 }
  0x97   :  { %643 = vsyncpa [#allocation6], 1 }
  0x98   :  { %645 = vsyncpa [#allocation6 + $0x1], 1 }

</bundles_post_ra>
